<compile_context>
chip_gen: v7x
topology: tpu7x:2x2x1
jax: 0.10.0
libtpu: 0.0.40
codegen_flags: <defaults>
</compile_context>

<pallas_src>
import jax
import jax.numpy as jnp
from jax import lax
from jax.experimental import pallas as pl
from jax.experimental.pallas import tpu as pltpu

K = 5
PAD = 2
EPS = 1e-5
NEG_SLOPE = 0.2


def _make_kernel(num_hw_tiles, hw_total, hw_tile):
    inv_hw = 1.0 / float(hw_total)

    def kernel(x_ref, w_ref, o_ref, *stats):
        # x_ref: (1, CKKp, hw_tile) bf16 im2col tile (spatial on lanes)
        # w_ref: (Cout, CKKp)       bf16
        # o_ref: (1, Cout, HW)      f32, resident across the spatial grid axis
        acc = jnp.dot(w_ref[...], x_ref[0],
                      preferred_element_type=jnp.float32)       # (Cout, hw_tile)

        if num_hw_tiles == 1:
            # Single-tile fast path: stats + normalize + LeakyReLU in one shot.
            mean = jnp.sum(acc, axis=1, keepdims=True) * inv_hw
            var = jnp.sum(acc * acc, axis=1, keepdims=True) * inv_hw - mean * mean
            y = (acc - mean) * lax.rsqrt(jnp.maximum(var, 0.0) + EPS)
            o_ref[0] = jnp.where(y >= 0, y, NEG_SLOPE * y)
            return

        sum_ref, ssq_ref = stats
        t = pl.program_id(1)

        @pl.when(t == 0)
        def _():
            sum_ref[...] = jnp.zeros_like(sum_ref)
            ssq_ref[...] = jnp.zeros_like(ssq_ref)

        sum_ref[...] += jnp.sum(acc, axis=1, keepdims=True)
        ssq_ref[...] += jnp.sum(acc * acc, axis=1, keepdims=True)

        # Raw conv tile into the resident output (lane-dense, 128-aligned).
        start = pl.multiple_of(t * hw_tile, 128)
        o_ref[0, :, pl.ds(start, hw_tile)] = acc

        @pl.when(t == num_hw_tiles - 1)
        def _():
            mean = sum_ref[...] * inv_hw
            var = jnp.maximum(ssq_ref[...] * inv_hw - mean * mean, 0.0)
            rstd = lax.rsqrt(var + EPS)
            y = (o_ref[0] - mean) * rstd
            o_ref[0] = jnp.where(y >= 0, y, NEG_SLOPE * y)

    return kernel


def _choose_hw_tile(hw, ckk_pad):
    """Largest multiple-of-128 divisor of hw whose bf16 patch tile fits ~2 MiB."""
    budget_bytes = 2 << 20
    cap = budget_bytes // (ckk_pad * 2)
    if hw <= cap or hw % 128 != 0:
        return hw                       # small or ragged HW: single tile
    best = 128
    for cand in range(256, min(cap, hw) + 1, 128):
        if hw % cand == 0:
            best = cand
    return best


def unet_reserve(x, weight, hw_tile=None):
    """UNetReserve forward. x: (N, Cin, H, W) f32, weight: (Cout, Cin, 5, 5) f32
    -> (N, Cout, H, W) f32."""
    N, Cin, H, W = x.shape
    Cout = weight.shape[0]
    HW = H * W
    CKK = Cin * K * K
    ckk_pad = ((CKK + 127) // 128) * 128

    # bf16 BEFORE the 25x im2col expansion: halves the amplified HBM traffic.
    x_bf16 = x.astype(jnp.bfloat16)
    x_pad = jnp.pad(x_bf16, ((0, 0), (0, 0), (PAD, PAD), (PAD, PAD)))
    # Contraction order is (Cin, ky, kx), matching weight.reshape(Cout, Cin*K*K).
    # TODO(synk): cut the 25x read amplification to ~5x at real feature-map sizes
    # by materializing only the 5 ky row-taps here and synthesizing the 5 kx
    # shifts in-kernel with pltpu.roll along the lane axis + edge masks.
    taps = [x_pad[:, :, ky:ky + H, kx:kx + W]
            for ky in range(K) for kx in range(K)]
    patches = jnp.stack(taps, axis=2).reshape(N, CKK, HW)       # lane-dense slab
    if ckk_pad != CKK:
        patches = jnp.pad(patches, ((0, 0), (0, ckk_pad - CKK), (0, 0)))
    w_mat = jnp.pad(weight.reshape(Cout, CKK),
                    ((0, 0), (0, ckk_pad - CKK))).astype(jnp.bfloat16)
    # TODO(synk): on v7x only, evaluate fp8 MXU operands here (keep f32 accumulation).

    if hw_tile is None:
        hw_tile = _choose_hw_tile(HW, ckk_pad)
    assert HW % hw_tile == 0 and (hw_tile == HW or hw_tile % 128 == 0)
    num_hw_tiles = HW // hw_tile

    kernel = _make_kernel(num_hw_tiles, HW, hw_tile)

    scratch_shapes = []
    if num_hw_tiles > 1:
        scratch_shapes = [pltpu.VMEM((Cout, 1), jnp.float32),   # sum
                          pltpu.VMEM((Cout, 1), jnp.float32)]   # sum of squares

    cost = pl.CostEstimate(
        flops=2 * N * Cout * ckk_pad * HW,
        transcendentals=N * Cout,
        bytes_accessed=(N * ckk_pad * HW * 2 + Cout * ckk_pad * 2
                        + N * Cout * HW * 4),
    )

    # VMEM need: double-buffered bf16 patch tile + double-buffered resident f32
    # output + weight (and its default second buffer) + slack.
    need = (2 * ckk_pad * hw_tile * 2 + 2 * Cout * HW * 4
            + 2 * Cout * ckk_pad * 2 + (2 << 20))
    vmem_limit = int(min(max(need, 32 << 20), 64 << 20))

    out = pl.pallas_call(
        kernel,
        out_shape=jax.ShapeDtypeStruct((N, Cout, HW), jnp.float32),
        grid=(N, num_hw_tiles),
        in_specs=[
            pl.BlockSpec((1, ckk_pad, hw_tile), lambda n, t: (n, 0, t)),
            # Constant index map: Pallas skips re-fetching this block per step.
            # TODO(synk): pipeline_mode=pl.Buffered(1) once VMEM-tight, to drop
            # the unused second weight buffer on v7x's 64 MiB VMEM.
            pl.BlockSpec((Cout, ckk_pad), lambda n, t: (0, 0)),
        ],
        out_specs=pl.BlockSpec((1, Cout, HW), lambda n, t: (n, 0, 0)),
        scratch_shapes=scratch_shapes,
        compiler_params=pltpu.CompilerParams(
            dimension_semantics=("parallel", "arbitrary"),
            vmem_limit_bytes=vmem_limit),
        cost_estimate=cost,
    )(patches, w_mat)

    # Reshape to NCHW in the wrapper (keeps kernel stores lane-dense).
    return out.reshape(N, Cout, H, W).astype(x.dtype)


def _reference(x, weight):
    conv = lax.conv_general_dilated(
        x, weight, window_strides=(1, 1),
        padding=[(PAD, PAD), (PAD, PAD)],
        dimension_numbers=("NCHW", "OIHW", "NCHW"),
    )
    m = conv.mean(axis=(2, 3), keepdims=True)
    v = ((conv - m) ** 2).mean(axis=(2, 3), keepdims=True)
    y = (conv - m) / jnp.sqrt(v + EPS)
    return jnp.where(y >= 0, y, NEG_SLOPE * y)


if __name__ == "__main__":
    key = jax.random.PRNGKey(0)
    kx, kw, kx2, kw2 = jax.random.split(key, 4)

    # Test 1: toy UNetReserve shapes (single spatial tile per sample).
    N, Cin, Cout, H, W = 2, 4, 8, 16, 16
    x = jax.random.normal(kx, (N, Cin, H, W), dtype=jnp.float32)
    weight = jax.random.normal(kw, (Cout, Cin, K, K), dtype=jnp.float32) / jnp.sqrt(
        jnp.float32(Cin * K * K))
    out = jax.block_until_ready(unet_reserve(x, weight))
    ref = _reference(x, weight)
    assert out.shape == (N, Cout, H, W)
    assert jnp.allclose(out, ref, atol=5e-2, rtol=5e-2)

    # Test 2: force the multi-spatial-tile path (resident output + VMEM stats).
    N2, Cin2, Cout2, H2, W2 = 2, 8, 16, 32, 32
    x2 = jax.random.normal(kx2, (N2, Cin2, H2, W2), dtype=jnp.float32)
    w2 = jax.random.normal(kw2, (Cout2, Cin2, K, K), dtype=jnp.float32) / jnp.sqrt(
        jnp.float32(Cin2 * K * K))
    out2 = jax.block_until_ready(unet_reserve(x2, w2, hw_tile=256))  # 4 tiles
    ref2 = _reference(x2, w2)
    assert out2.shape == (N2, Cout2, H2, W2)
    assert jnp.allclose(out2, ref2, atol=5e-2, rtol=5e-2)

    print("KERNEL_OK")
</pallas_src>

<mosaic_0001>
module attributes {stable_mosaic.version = 11 : i64} {
  func.func @kernel(%arg0: i32, %arg1: i32, %arg2: memref<1x128x256xbf16, #tpu.memory_space<vmem>>, %arg3: memref<8x128xbf16, #tpu.memory_space<vmem>>, %arg4: memref<1x8x256xf32, #tpu.memory_space<vmem>>) attributes {dimension_semantics = [#tpu.dimension_semantics<parallel>, #tpu.dimension_semantics<arbitrary>], iteration_bounds = array<i64: 2, 1>, scalar_prefetch = 0 : i64, scratch_operands = 0 : i64, tpu.core_type = #tpu.core_type<tc>, window_params = [{transform_indices = @transform_0, window_bounds = array<i64: 1, 128, 256>}, {pipeline_mode = #tpu.pipeline_mode<synchronous>, transform_indices = @transform_1, window_bounds = array<i64: 8, 128>}, {transform_indices = @transform_2, window_bounds = array<i64: 1, 8, 256>}]} {
    %c0 = arith.constant 0 : index
    %c0_0 = arith.constant 0 : index
    %0 = vector.load %arg3[%c0, %c0_0] : memref<8x128xbf16, #tpu.memory_space<vmem>>, vector<8x128xbf16>
    %c0_1 = arith.constant 0 : index
    %c0_2 = arith.constant 0 : index
    %c0_3 = arith.constant 0 : index
    %1 = vector.load %arg2[%c0_1, %c0_2, %c0_3] : memref<1x128x256xbf16, #tpu.memory_space<vmem>>, vector<1x128x256xbf16>
    %2 = vector.shape_cast %1 : vector<1x128x256xbf16> to vector<128x256xbf16>
    %cst = arith.constant dense<0.000000e+00> : vector<8x256xf32>
    %3 = tpu.matmul %0, %2, %cst {dimension_numbers = #tpu.dot_dimension_numbers<[1], [0], [0], [1], [0, 0, 1, 1], [], []>} : vector<8x128xbf16>, vector<128x256xbf16>, vector<8x256xf32> -> vector<8x256xf32>
    %cst_4 = arith.constant dense<0.000000e+00> : vector<8xf32>
    %4 = vector.multi_reduction <add>, %3, %cst_4 [1] : vector<8x256xf32> to vector<8xf32>
    %5 = vector.shape_cast %4 : vector<8xf32> to vector<8x1xf32>
    %cst_5 = arith.constant 3.906250e-03 : f32
    %6 = vector.broadcast %cst_5 : f32 to vector<8x1xf32>
    %7 = arith.mulf %5, %6 : vector<8x1xf32>
    %8 = arith.mulf %3, %3 : vector<8x256xf32>
    %cst_6 = arith.constant dense<0.000000e+00> : vector<8xf32>
    %9 = vector.multi_reduction <add>, %8, %cst_6 [1] : vector<8x256xf32> to vector<8xf32>
    %10 = vector.shape_cast %9 : vector<8xf32> to vector<8x1xf32>
    %cst_7 = arith.constant 3.906250e-03 : f32
    %11 = vector.broadcast %cst_7 : f32 to vector<8x1xf32>
    %12 = arith.mulf %10, %11 : vector<8x1xf32>
    %13 = arith.mulf %7, %7 : vector<8x1xf32>
    %14 = arith.subf %12, %13 : vector<8x1xf32>
    %15 = vector.broadcast %7 : vector<8x1xf32> to vector<8x256xf32>
    %16 = arith.subf %3, %15 : vector<8x256xf32>
    %cst_8 = arith.constant 0.000000e+00 : f32
    %17 = vector.broadcast %cst_8 : f32 to vector<8x1xf32>
    %18 = arith.maximumf %14, %17 : vector<8x1xf32>
    %cst_9 = arith.constant 9.99999974E-6 : f32
    %19 = vector.broadcast %cst_9 : f32 to vector<8x1xf32>
    %20 = arith.addf %18, %19 : vector<8x1xf32>
    %21 = math.rsqrt %20 : vector<8x1xf32>
    %22 = vector.broadcast %21 : vector<8x1xf32> to vector<8x256xf32>
    %23 = arith.mulf %16, %22 : vector<8x256xf32>
    %cst_10 = arith.constant 0.000000e+00 : f32
    %24 = vector.broadcast %cst_10 : f32 to vector<8x256xf32>
    %25 = arith.cmpf oge, %23, %24 : vector<8x256xf32>
    %cst_11 = arith.constant 2.000000e-01 : f32
    %26 = vector.broadcast %cst_11 : f32 to vector<8x256xf32>
    %27 = arith.mulf %26, %23 : vector<8x256xf32>
    %28 = arith.select %25, %23, %27 : vector<8x256xi1>, vector<8x256xf32>
    %c0_12 = arith.constant 0 : index
    %c0_13 = arith.constant 0 : index
    %c0_14 = arith.constant 0 : index
    %29 = vector.load %arg4[%c0_12, %c0_13, %c0_14] : memref<1x8x256xf32, #tpu.memory_space<vmem>>, vector<1x8x256xf32>
    %30 = vector.shape_cast %29 : vector<1x8x256xf32> to vector<8x256xf32>
    %31 = vector.shape_cast %28 : vector<8x256xf32> to vector<1x8x256xf32>
    tpu.vector_store %arg4[%c0_12, %c0_13, %c0_14], %31 {strides = array<i32>} : memref<1x8x256xf32, #tpu.memory_space<vmem>>, vector<1x8x256xf32>,
    return
  }
  func.func @transform_0(%arg0: i32, %arg1: i32) -> (i32, i32, i32) {
    %c0_i32 = arith.constant 0 : i32
    %c0_i32_0 = arith.constant 0 : i32
    return %arg0, %c0_i32, %arg1 : i32, i32, i32
  }
  func.func @transform_1(%arg0: i32, %arg1: i32) -> (i32, i32) {
    %c0_i32 = arith.constant 0 : i32
    %c0_i32_0 = arith.constant 0 : i32
    %c0_i32_1 = arith.constant 0 : i32
    return %c0_i32, %c0_i32_0 : i32, i32
  }
  func.func @transform_2(%arg0: i32, %arg1: i32) -> (i32, i32, i32) {
    %c0_i32 = arith.constant 0 : i32
    %c0_i32_0 = arith.constant 0 : i32
    %c0_i32_1 = arith.constant 0 : i32
    return %arg0, %c0_i32, %c0_i32_0 : i32, i32, i32
  }
}

</mosaic_0001>

<bundles_post_ra>
// kernel: tpu_custom_call.1
= control target key start
LH: loop header
LB: loop body
LE: loop exit
PB: predicated region body
PF: predicated region fallthrough
CT: control target
= control target key end

     0   :  { %7 = vsyncpa [#allocation3], 0  ;;  %s1003_s0 = inlined_call_operand.hbm [shape: bf16[2,128,256], index: 0, kind: input, shape index: {}]   ;;  %s1004_s1 = inlined_call_operand.hbm [shape: bf16[8,128], index: 1, kind: input, shape index: {}]   ;;  %s1005_s2 = inlined_call_operand.hbm [shape: f32[2,8,256], index: 2, kind: output, shape index: {}]  }
   0x1   :  { %9 = vsyncpa [#allocation3 + $0x1], 0 }
   0x2   :  { %10 = vsyncpa [#allocation6], 0 }
   0x3   :  { %11 = vsyncpa [#allocation4], 0 }
   0x4   :  { %13 = vsyncpa [#allocation4 + $0x1], 0  ;;  %s765_s9 = smov 0   ;;  %s767_s10 = smov 0  }
   0x5   :  { %s769_s11 = smov 0   ;;  %s771_s12 = smov 0  }
   0x6   :  { %s773_s13 = smov 0   ;;  %s775_s14 = smov 0  }
   0x7 LB: > { %s461_s15 = sadd.s32 4294967295, %s742_s14   ;;  %s462_s16 = sadd.s32 4294967294, %s742_s14   ;;  %s742_s14 = sphi %s775_s14, %s19_s14   ;;  %s738_s13 = sphi %s773_s13, %s1033_s13   ;;  %s734_s12 = sphi %s771_s12, %s1032_s12   ;;  %s730_s11 = sphi %s769_s11, %s1031_s11   ;;  %s726_s10 = sphi %s767_s10, %s1030_s10   ;;  %s722_s9 = sphi %s765_s9, %s1029_s9  }
   0x8   : > { %s40_s17 = sadd.s32 1, %s730_s11  ;;  %p47_p0 = scmp.ne.s32.totalorder %s730_s11, %s726_s10 }
   0x9   : > { %p48_p1 = scmp.eq.s32.totalorder %s742_s14, 0  ;;  %p53_p2 = scmp.ne.s32.totalorder %s726_s10, %s722_s9 }
   0xa   : > { %p803_p3 = scmp.eq.s32.totalorder %s461_s15, 0  ;;  %p98_p4 = scmp.eq.s32.totalorder %s461_s15, 1 }
   0xb   : > { %p807_p5 = por %p48_p1, %p47_p0  ;;  %p104_p6 = scmp.eq.s32.totalorder %s462_s16, 1 }
   0xc   : > { %s1012_s18 = scalar_select %p803_p3, 1, 0 }
   0xd   : > { %p813_p7 = por %p803_p3, %p53_p2  ;;  %p817_p8 = por %p98_p4, %p47_p0 }
   0xe   : > { %p821_p9 = por %p104_p6, %p53_p2  ;;  %p463_p10 = scmp.ge.s32.totalorder %s742_s14, 1 }
   0xf   : > { %s1014_s20 = scalar_select %p813_p7, 1, 0 }
  0x10   : > { %s1015_s21 = scalar_select %p817_p8, 1, 0 }
  0x11   : > { %s1016_s22 = scalar_select %p821_p9, 1, 0 }
  0x12   : > { %p111_p11 = scmp.lt.s32.totalorder %s742_s14, 3  ;;  %s744_s24 = smov [#allocation5]  }
  0x13   : > { %s124_s25 = sshll.u32 %s744_s24, 4  ;;  %p517_p1 = scmp.lt.s32.totalorder %s742_s14, 2  ;;  %s125_s25 = int_to_ptr.vmem [resolvable:$true] %s124_s25 }
  0x14   : > { %p828_p13 = pnand %p463_p10, %p111_p11  ;;  %s31_s28 = sadd.s32 1, %s738_s13 }
  0x15   : > { %p837_p4 = pnand %p517_p1, %p807_p5  ;;  %p848_p6 = scmp.ge.s32.totalorder %s31_s28, 2 }
  0x16   : > { %s1017_s23 = scalar_select %p828_p13, 1, 0 }
  0x17   : > { %p504_p0 = pneg %p828_p13  ;;  %s135_s30 = sand.u32 1, %s730_s11  }
  0x18   : > { %s1018_s26 = scalar_select %p837_p4, 1, 0 }
  0x19   : > { %p843_p2 = pnand %p504_p0, %p803_p3  ;;  %s598_s5 = scalar_lea.hbm %s1004_s1, 64 }
  0x1a   : > { %s1020_s29 = scalar_select %p848_p6, 1, 0 }
  0x1b   : > { %p599_p5 = scmp.ne.s32.totalorder %s1004_s1, %s598_s5  ;;  %p600_p10 = pneg %p843_p2 }
  0x1c   : > { %p605_p0 = scmp.lt.u32.totalorder %s598_s5, %s1004_s1 }
  0x1d   : > { %p601_p11 = pnand %p600_p10, %p599_p5 }
  0x1f   : > { %p602_p1 = pneg %p601_p11 }
  0x21   : > { %p607_p12 = pnand %p605_p0, %p602_p1 }
  0x23   : > { %610 = shalt.err (!%p607_p12)
}
  0x24   : > { %s611_s16 = scalar_lea.vmem %s125_s25, 64  ;;  %p619_p7 = scmp.lt.s32.totalorder %s125_s25, %s125_s25 }
  0x25   : > { %p612_p9 = scmp.ne.s32.totalorder %s125_s25, %s611_s16  ;;  %p620_p13 = scmp.lt.s32.totalorder %s611_s16, %s611_s16 }
  0x27   : > { %p614_p8 = pnand %p612_p9, %p600_p10  ;;  %p621_p4 = por %p620_p13, %p619_p7 }
  0x29   : > { %p615_p3 = pneg %p614_p8 }
  0x2b   : > { %p622_p6 = pnand %p621_p4, %p615_p3 }
  0x2d   : > { %625 = shalt.err (!%p622_p6)
}
  0x2e   : > { %507 = dma.hbm_to_vmem [thread:$0]  (!%p843_p2), %s1004_s1, 64, %s125_s25, [#allocation6]  }
  0x2f   : > { %p1021_p9 = scmp.ne.s32.totalorder %s1020_s29, 0  ;;  %s466_s3 = sshll.u32 %s135_s30, 7 }
  0x30   : > { %s494_s5 = sshll.u32 %s738_s13, 11  ;;  %s139_s8 = scalar_lea.vmem [#allocation2], %s466_s3 }
  0x31   : > { %s1035_s28 = smov (%p1021_p9, %s31_s28), 0  ;;  %s879_s7 = scalar_lea.hbm %s1003_s0, %s494_s5 }
  0x32   : > { %s35_s4 = ssub.s32 %s738_s13, %s1035_s28  ;;  %s148_s15 = sshll.u32 %s139_s8, 4  ;;  %s886_s15 = int_to_ptr.vmem [resolvable:$true] %s148_s15 }
  0x33   : > { %p38_p3 = scmp.eq.s32.totalorder %s35_s4, 0  ;;  %s888_s29 = scalar_lea.sflag [#allocation3], %s135_s30 }
  0x34   : > { %s626_s16 = scalar_lea.hbm %s879_s7, 2048  ;;  %p1022_p8 = scmp.ne.s32.totalorder %s1018_s26, 0 }
  0x35   : > { %s884_s25 = scalar_select %p38_p3, %s730_s11, %s40_s17  }
  0x36   : > { %p627_p7 = scmp.ne.s32.totalorder %s879_s7, %s626_s16  ;;  %p628_p12 = pneg %p1022_p8 }
  0x37   : > { %s631_s3 = scalar_lea.hbm %s1003_s0, 4096  ;;  %p632_p2 = scmp.lt.u32.totalorder %s879_s7, %s1003_s0 }
  0x38   : > { %p629_p13 = pnand %p628_p12, %p627_p7  ;;  %p633_p6 = scmp.lt.u32.totalorder %s631_s3, %s626_s16 }
  0x39   : > { %p635_p10 = scmp.lt.u32.totalorder %s626_s16, %s879_s7 }
  0x3a   : > { %p630_p4 = pneg %p629_p13  ;;  %p634_p5 = por %p633_p6, %p632_p2 }
  0x3c   : > { %p636_p11 = por %p635_p10, %p634_p5 }
  0x3e   : > { %p637_p1 = pnand %p636_p11, %p630_p4 }
  0x40   : > { %640 = shalt.err (!%p637_p1)
}
  0x41   : > { %s641_s17 = scalar_lea.vmem %s886_s15, 2048  ;;  %s745_s30 = smov [#allocation2]  }
  0x42   : > { %p642_p0 = scmp.ne.s32.totalorder %s886_s15, %s641_s17  ;;  %s646_s27 = sshll.u32 %s745_s30, 4  ;;  %s647_s27 = int_to_ptr.vmem [resolvable:$false] %s646_s27 }
  0x43   : > { %s648_s6 = scalar_lea.vmem %s647_s27, 4096  ;;  %p649_p7 = scmp.lt.s32.totalorder %s886_s15, %s647_s27 }
  0x44   : > { %p644_p9 = pnand %p642_p0, %p628_p12  ;;  %p650_p13 = scmp.lt.s32.totalorder %s648_s6, %s641_s17 }
  0x46   : > { %p645_p3 = pneg %p644_p9  ;;  %p651_p2 = por %p650_p13, %p649_p7 }
  0x48   : > { %p652_p6 = pnand %p651_p2, %p645_p3 }
  0x4a   : > { %655 = shalt.err (!%p652_p6)
}
  0x4b   : > { %s746_s8 = smov 128   ;;  %s747_s16 = smov 8  }
  0x4c   : > { %511 = dma.hbm_to_vmem [thread:$0]  (!%p1022_p8), %s879_s7, 2048, %s886_s15, %s888_s29, %s746_s8, %s746_s8, %s747_s16  }
  0x4d   : > { %p1023_p12 = scmp.ne.s32.totalorder %s1017_s23, 0 }
  0x4e   : > { %s919_s19 = sand.u32 (!%p1023_p12), 1, %s726_s10   ;;  %p1024_p4 = scmp.ne.s32.totalorder (!%p1023_p12), %s1014_s20, 0 }
  0x4f   : > { %160 = sbr.rel (%p1023_p12) target bundleno = 522 (0x20a), region = 28  ;;  %s470_s24 = sshll.u32 (!%p1023_p12), %s919_s19, 7 }
  0x50   : > { %s163_s3 = scalar_lea.sflag (!%p1023_p12), [#allocation3], %s919_s19  ;;  %s923_s4 = scalar_lea.vmem (!%p1023_p12), [#allocation2], %s470_s24 }
  0x56   : > { %709 = dma.done.wait (%p1024_p4), %s163_s3, 2048  }
  0x57   : > { %711 = vsyncadd (%p1024_p4), %s163_s3, 4294965248  ;;  %p1025_p8 = scmp.ne.s32.totalorder %s1012_s18, 0 }
  0x59   : > { %713 = dma.done.wait (%p1025_p8), [#allocation6], 64  }
  0x5a   : > { %715 = vsyncadd (%p1025_p8), [#allocation6], 4294967232  ;;  %v748_v0 = vmov 0   ;;  %v572_v1 = vld [vmem:[%s923_s4 + $0x4] ss:$8 sps:$4 sm:$0xff]   ;;  %s472_s18 = sshll.u32 %s919_s19, 4 }
  0x5b   : > { %322 = vmatprep.mubr.bf16.mxu0 %v748_v0  ;;  %v574_v2 = vld [vmem:[%s923_s4] ss:$8 sps:$4 sm:$0xff]   ;;  %290 = vmatprep.subr.bf16.mxu0 %v572_v1  ;;  %v575_v3 = vld [vmem:[%s923_s4 + $0x14] ss:$8 sps:$4 sm:$0xff]   ;;  %v577_v4 = vld [vmem:[%s923_s4 + $0x10] ss:$8 sps:$4 sm:$0xff]  }
  0x5c   : > { %291 = vmatpush1.bf16.msra.mxu0 %v574_v2  ;;  %v578_v5 = vld [vmem:[%s923_s4 + $0x24] ss:$8 sps:$4 sm:$0xff]   ;;  %v580_v6 = vld [vmem:[%s923_s4 + $0x20] ss:$8 sps:$4 sm:$0xff]   ;;  %v581_v7 = vld [vmem:[%s923_s4 + $0x34] ss:$8 sps:$4 sm:$0xff]  }
  0x5d   : > { %292 = vmatprep.subr.bf16.mxu0 %v575_v3  ;;  %v583_v8 = vld [vmem:[%s923_s4 + $0x30] ss:$8 sps:$4 sm:$0xff]   ;;  %v584_v9 = vld [vmem:[%s923_s4 + $0x44] ss:$8 sps:$4 sm:$0xff]   ;;  %v586_v10 = vld [vmem:[%s923_s4 + $0x40] ss:$8 sps:$4 sm:$0xff]  }
  0x5e   : > { %v587_v11 = vld [vmem:[%s923_s4 + $0x54] ss:$8 sps:$4 sm:$0xff]   ;;  %v589_v12 = vld [vmem:[%s923_s4 + $0x50] ss:$8 sps:$4 sm:$0xff]   ;;  %v590_v13 = vld [vmem:[%s923_s4 + $0x64] ss:$8 sps:$4 sm:$0xff]  }
  0x5f   : > { %v592_v14 = vld [vmem:[%s923_s4 + $0x60] ss:$8 sps:$4 sm:$0xff]   ;;  %v593_v15 = vld [vmem:[%s923_s4 + $0x74] ss:$8 sps:$4 sm:$0xff]   ;;  %v595_v16 = vld [vmem:[%s923_s4 + $0x70] ss:$8 sps:$4 sm:$0xff]  }
  0x60   : > { %293 = vmatpush1.bf16.msra.mxu0 %v577_v4  ;;  %v193_v17 = vld [vmem:[#allocation5] sm:$0xf]  ;;  %s495_s20 = sshll.u32 %s734_s12, 8  ;;  %s190_s23 = scalar_lea.vmem [#allocation7], %s472_s18 }
  0x61   : > { %294 = vmatprep.subr.bf16.mxu0 %v578_v5  ;;  %s373_s26 = sshll.u32 %s190_s23, 4  ;;  %s954_s29 = scalar_lea.hbm %s1005_s2, %s495_s20  ;;  %s956_s26 = int_to_ptr.vmem [resolvable:$true] %s373_s26 }
  0x62   : > { %s359_s12 = scalar_lea.sflag [#allocation4], %s919_s19  ;;  %s656_s5 = scalar_lea.vmem %s956_s26, 256 }
  0x63   : > { %p657_p5 = scmp.ne.s32.totalorder %s956_s26, %s656_s5  ;;  %p1026_p10 = scmp.ne.s32.totalorder %s1015_s21, 0 }
  0x64   : > { %295 = vmatpush1.bf16.msra.mxu0 %v580_v6  ;;  %s749_s17 = smov [#allocation7]  }
  0x65   : > { %296 = vmatprep.subr.bf16.mxu0 %v581_v7  ;;  %p658_p11 = pnand %p657_p5, %p1026_p10  ;;  %s660_s30 = sshll.u32 %s749_s17, 4  ;;  %s661_s30 = int_to_ptr.vmem [resolvable:$false] %s660_s30 }
  0x66   : > { %s662_s27 = scalar_lea.vmem %s661_s30, 512  ;;  %p663_p0 = scmp.lt.s32.totalorder %s956_s26, %s661_s30 }
  0x67   : > { %p659_p1 = pneg %p658_p11  ;;  %p664_p9 = scmp.lt.s32.totalorder %s662_s27, %s656_s5 }
  0x68   : > { %297 = vmatpush1.bf16.msra.mxu0 %v583_v8 }
  0x69   : > { %298 = vmatprep.subr.bf16.mxu0 %v584_v9  ;;  %p665_p3 = por %p664_p9, %p663_p0 }
  0x6b   : > { %p666_p7 = pnand %p665_p3, %p659_p1 }
  0x6c   : > { %299 = vmatpush1.bf16.msra.mxu0 %v586_v10 }
  0x6d   : > { %300 = vmatprep.subr.bf16.mxu0 %v587_v11 }
  0x70   : > { %301 = vmatpush1.bf16.msra.mxu0 %v589_v12 }
  0x71   : > { %302 = vmatprep.subr.bf16.mxu0 %v590_v13 }
  0x74   : > { %303 = vmatpush1.bf16.msra.mxu0 %v592_v14 }
  0x75   : > { %304 = vmatprep.subr.bf16.mxu0 %v593_v15 }
  0x78   : > { %305 = vmatpush1.bf16.msra.mxu0 %v595_v16 }
  0x7b   : > { %323 = vmatmul.mubr.bf16.vlgmr.msra.gmra.mrb[0].mxu0 %v193_v17 }
 0x14e   : > { %v324_v18 = vpop.f32.mrb[0].mxu0 }
 0x14f   : > { %v326_v19 = vpop.f32.mrb[1].mxu0  ;;  %v335_v20 = vmul.f32 %v324_v18, %v324_v18 }
 0x150   : > { %v328_v21 = vpop.f32.mrb[2].mxu0  ;;  %v331_v22 = vadd.f32 %v326_v19, %v324_v18  ;;  %v336_v23 = vmul.f32 %v326_v19, %v326_v19 }
 0x151   : > { %v329_v24 = vpop.f32.mrb[3].mxu0 }
 0x152   : > { %332 = vadd.xlane.f32.xlu0 %v331_v22  ;;  %v337_v25 = vadd.f32 %v336_v23, %v335_v20 }
 0x156   : > { %338 = vadd.xlane.f32.xlu0 %v337_v25 }
 0x1df   : > { %v333_v26 = vpop.xlane.xlu0 %332 }
 0x1e0   : > { %v334_v27 = vmul.f32 0.00390625, %v333_v26 }
 0x1e2   : > { %v341_v29 = vmul.f32 %v334_v27, %v334_v27  ;;  %v343_v34 = vsub.f32 %v324_v18, %v334_v27  ;;  %v344_v35 = vsub.f32 %v326_v19, %v334_v27 }
 0x1e3   : > { %v339_v28 = vpop.xlane.xlu0 %338 }
 0x1e4   : > { %v340_v30 = vmul.f32 0.00390625, %v339_v28 }
 0x1e6   : > { %v342_v31 = vsub.f32 %v340_v30, %v341_v29 }
 0x1e8   : > { %v345_v32 = vmax.f32 %v342_v31, 0.0 }
 0x1ea   : > { %v346_v33 = vadd.f32 1e-05, %v345_v32 }
 0x1ec   : > { %596 = vrsqrt.f32 %v346_v33 }
 0x1f6   : > { %v597_v36 = vpop.eup %596 }
 0x1f7   : > { %v348_v37 = vmul.f32 %v597_v36, %v343_v34  ;;  %v349_v38 = vmul.f32 %v597_v36, %v344_v35 }
 0x1f9   : > { %vm350_vm0 = vcmp.ge.f32.partialorder %v348_v37, 0.0  ;;  %vm351_vm1 = vcmp.ge.f32.partialorder %v349_v38, 0.0  ;;  %v352_v39 = vmul.f32 0.2, %v348_v37  ;;  %v353_v40 = vmul.f32 0.2, %v349_v38 }
 0x1fb   : > { %v354_v41 = vsel %vm350_vm0, %v348_v37, %v352_v39  ;;  %v355_v42 = vsel %vm351_vm1, %v349_v38, %v353_v40 }
 0x1fc   : > { %356 = vst [vmem:[%s190_s23] sm:$0xff] %v354_v41  ;;  %357 = vst [vmem:[%s190_s23 + $0x8] sm:$0xff] %v355_v42 }
 0x1fd   : > { %669 = shalt.err (!%p666_p7)
}
 0x1fe   : > { %s670_s6 = scalar_lea.hbm %s954_s29, 256  ;;  %s674_s19 = scalar_lea.hbm %s1005_s2, 512 }
 0x1ff   : > { %p671_p13 = scmp.ne.s32.totalorder %s954_s29, %s670_s6  ;;  %p675_p12 = scmp.lt.u32.totalorder %s954_s29, %s1005_s2 }
 0x200   : > { %p676_p4 = scmp.lt.u32.totalorder %s674_s19, %s670_s6  ;;  %p678_p5 = scmp.lt.u32.totalorder %s670_s6, %s954_s29 }
 0x201   : > { %p672_p2 = pnand %p671_p13, %p1026_p10 }
 0x202   : > { %p677_p8 = por %p676_p4, %p675_p12 }
 0x203   : > { %p673_p6 = pneg %p672_p2 }
 0x204   : > { %p679_p11 = por %p678_p5, %p677_p8 }
 0x206   : > { %p680_p1 = pnand %p679_p11, %p673_p6 }
 0x208   : > { %683 = shalt.err (!%p680_p1)
}
 0x209   : > { %502 = dma.vmem_to_hbm [thread:$0]  (%p1026_p10), %s956_s26, 256, %s954_s29, %s359_s12  }
 0x20a PF: > { %s385_s4 = sand.u32 1, %s722_s9   ;;  %p1027_p0 = scmp.ne.s32.totalorder %s1016_s22, 0 }
 0x20b   : > { %p1028_p9 = scmp.ge.s32.totalorder %s742_s14, 2  ;;  %s386_s18 = scalar_lea.sflag [#allocation4], %s385_s4 }
 0x20d   : > { %p513_p3 = pnand %p1028_p9, %p1027_p0 }
 0x20f   : > { %717 = dma.done.wait (!%p513_p3), %s386_s18, 256  }
 0x210   : > { %719 = vsyncadd (!%p513_p3), %s386_s18, 4294967040  ;;  %s19_s14 = sadd.s32 1, %s742_s14   ;;  %s1029_s9 = smov %s726_s10 }
 0x211   : > { %p16_p7 = scmp.ge.s32.totalorder %s19_s14, 4   ;;  %s1030_s10 = smov %s730_s11 }
 0x212   : > { %s1031_s11 = smov %s884_s25  ;;  %s1032_s12 = smov %s738_s13 }
 0x213   : > { %s1033_s13 = smov %s1035_s28  ;;  %18 = sbr.rel (!%p16_p7) target bundleno = 7 (0x7), region = 77 }
 0x21a   :  { %391 = vsyncpa [#allocation3], 1 }
 0x21b   :  { %393 = vsyncpa [#allocation3 + $0x1], 1 }
 0x21c   :  { %394 = vsyncpa [#allocation6], 1 }
 0x21d   :  { %395 = vsyncpa [#allocation4], 1 }
 0x21e   :  { %397 = vsyncpa [#allocation4 + $0x1], 1 }

</bundles_post_ra>
